<compile_context>
chip_gen: v7x
topology: tpu7x:2x2x1
jax: 0.10.0
libtpu: 0.0.40
codegen_flags: <defaults>
</compile_context>

<pallas_src>
import jax
import jax.numpy as jnp
from jax.experimental import pallas as pl
from jax.experimental.pallas import tpu as pltpu

K_IN = 133       # fc1 in_features
DIMS = [(K_IN, 64), (64, 64), (64, 64), (64, 16), (16, 1)]
MAX_TB = 4096    # batch-tile cap: ~2.2 MiB/step of x DMA, well under VMEM


def _round_up(x, m):
    return ((x + m - 1) // m) * m


def _choose_tb(B):
    """Batch tile: aim for >=4 grid steps (keeps both v7x TCs busy and lets
    the per-core pipeline overlap DMA/compute), cap at MAX_TB, multiple of 8."""
    tb = min(MAX_TB, _round_up(max(1, (B + 3) // 4), 16))
    tb = min(tb, _round_up(B, 8))
    return max(tb, 8)


def _mlp_kernel(x_ref,
                w1_ref, b1_ref,
                w2_ref, b2_ref,
                w3_ref, b3_ref,
                w4_ref, b4_ref,
                w5_ref, b5_ref,
                o_ref):
    """One batch tile: 4 bf16 MXU matmuls + a VPU reduce, fused bias+ReLU."""

    def layer(h_bf16, w_ref, b_ref):
        # bf16 x bf16 operands, f32 accumulation on the MXU; bias+ReLU in f32.
        y = jnp.dot(h_bf16, w_ref[...], preferred_element_type=jnp.float32)
        return jnp.maximum(y + b_ref[...], 0.0)

    # x arrives as f32 straight from HBM; cast to bf16 on the VPU in-kernel.
    x_bf16 = x_ref[...].astype(jnp.bfloat16)

    h = layer(x_bf16, w1_ref, b1_ref)                     # (TB, 64)  f32
    h = layer(h.astype(jnp.bfloat16), w2_ref, b2_ref)     # (TB, 64)
    h = layer(h.astype(jnp.bfloat16), w3_ref, b3_ref)     # (TB, 64)
    h = layer(h.astype(jnp.bfloat16), w4_ref, b4_ref)     # (TB, 16)

    # Final Linear(16->1): N=1 matmul wastes the MXU -> VPU multiply + reduce.
    y = jnp.sum(h * w5_ref[...], axis=-1, keepdims=True) + b5_ref[...]
    o_ref[...] = jnp.maximum(y, 0.0).astype(o_ref.dtype)


def init_params(key):
    """Deterministic PyTorch-style init: U(-1/sqrt(fan_in), 1/sqrt(fan_in))."""
    params = []
    for (fan_in, fan_out) in DIMS:
        key, kw, kb = jax.random.split(key, 3)
        bound = 1.0 / jnp.sqrt(jnp.float32(fan_in))
        w = jax.random.uniform(kw, (fan_in, fan_out), jnp.float32, -bound, bound)
        b = jax.random.uniform(kb, (1, fan_out), jnp.float32, -bound, bound)
        params.append((w, b))
    return params


def prepare_params(params):
    """One-time weight prep (bf16 casts, row reshapes) hoisted out of the
    forward pass so the per-call graph is just the pallas_call."""
    (w1, b1), (w2, b2), (w3, b3), (w4, b4), (w5, b5) = params
    return (
        w1.astype(jnp.bfloat16), b1.reshape(1, 64).astype(jnp.float32),
        w2.astype(jnp.bfloat16), b2.reshape(1, 64).astype(jnp.float32),
        w3.astype(jnp.bfloat16), b3.reshape(1, 64).astype(jnp.float32),
        w4.astype(jnp.bfloat16), b4.reshape(1, 16).astype(jnp.float32),
        w5.reshape(1, 16).astype(jnp.float32),
        b5.reshape(1, 1).astype(jnp.float32),
    )


@jax.jit
def net_forward(x, prep):
    (w1, b1, w2, b2, w3, b3, w4, b4, w5r, b5r) = prep
    B = x.shape[0]
    TB = _choose_tb(B)
    grid = (pl.cdiv(B, TB),)   # ragged tail handled by block clipping

    def const_spec(shape):
        # Same block every grid step -> stays VMEM-resident.
        return pl.BlockSpec(shape, lambda i: (0, 0))

    flops = 2 * B * (K_IN * 64 + 64 * 64 + 64 * 64 + 64 * 16 + 16 * 1)
    weight_bytes = (K_IN * 64 + 64 * 64 + 64 * 64 + 64 * 16) * 2 \
        + (64 + 64 + 64 + 16 + 16 + 1) * 4
    bytes_accessed = B * (K_IN * 4 + 1 * 4) + weight_bytes

    out = pl.pallas_call(
        _mlp_kernel,
        out_shape=jax.ShapeDtypeStruct((B, 1), jnp.float32),
        grid=grid,
        in_specs=[
            # x streamed once as f32; last dim (133) == full array dim.
            pl.BlockSpec((TB, K_IN), lambda i: (i, 0)),
            const_spec((K_IN, 64)), const_spec((1, 64)),   # fc1
            const_spec((64, 64)),   const_spec((1, 64)),   # fc2
            const_spec((64, 64)),   const_spec((1, 64)),   # fc3
            const_spec((64, 16)),   const_spec((1, 16)),   # fc4
            const_spec((1, 16)),    const_spec((1, 1)),    # fc5 (VPU path)
        ],
        out_specs=pl.BlockSpec((TB, 1), lambda i: (i, 0)),
        compiler_params=pltpu.CompilerParams(
            dimension_semantics=("parallel",),
            vmem_limit_bytes=32 * 1024 * 1024,   # v7x-safe scoped limit
        ),
        cost_estimate=pl.CostEstimate(
            flops=flops, transcendentals=0, bytes_accessed=bytes_accessed),
    )(x, w1, b1, w2, b2, w3, b3, w4, b4, w5r, b5r)

    return out


def net_forward_ref(x, params):
    """Pure-JAX reference with matching bf16-operand / f32-accum numerics."""
    (w1, b1), (w2, b2), (w3, b3), (w4, b4), (w5, b5) = params
    h = x
    for (w, b) in [(w1, b1), (w2, b2), (w3, b3), (w4, b4)]:
        y = jnp.dot(h.astype(jnp.bfloat16), w.astype(jnp.bfloat16),
                    preferred_element_type=jnp.float32)
        h = jnp.maximum(y + b, 0.0)
    return jnp.maximum(h @ w5 + b5, 0.0)


if __name__ == "__main__":
    key = jax.random.PRNGKey(0)
    key, kx1, kx2 = jax.random.split(key, 3)

    params = init_params(key)
    prep = prepare_params(params)

    # Small benchmark-style batch (exact single tile).
    x_small = jax.random.normal(kx1, (8, K_IN), dtype=jnp.float32)
    out_small = net_forward(x_small, prep)
    jax.block_until_ready(out_small)
    ref_small = net_forward_ref(x_small, params)
    assert out_small.shape == (8, 1), out_small.shape
    assert jnp.allclose(out_small, ref_small, atol=1e-3, rtol=1e-3), \
        "mismatch vs reference (small batch)"

    # Ragged batch exercising the cdiv tail-block path (grid=3, partial tile).
    x_ragged = jax.random.normal(kx2, (37, K_IN), dtype=jnp.float32)
    out_ragged = net_forward(x_ragged, prep)
    jax.block_until_ready(out_ragged)
    ref_ragged = net_forward_ref(x_ragged, params)
    assert out_ragged.shape == (37, 1), out_ragged.shape
    assert jnp.allclose(out_ragged, ref_ragged, atol=1e-3, rtol=1e-3), \
        "mismatch vs reference (ragged batch)"

    print("KERNEL_OK")
</pallas_src>

<mosaic_0001>
module attributes {stable_mosaic.version = 11 : i64} {
  func.func @_mlp_kernel(%arg0: i32, %arg1: memref<8x133xf32, #tpu.memory_space<vmem>>, %arg2: memref<133x64xbf16, #tpu.memory_space<vmem>>, %arg3: memref<1x64xf32, #tpu.memory_space<vmem>>, %arg4: memref<64x64xbf16, #tpu.memory_space<vmem>>, %arg5: memref<1x64xf32, #tpu.memory_space<vmem>>, %arg6: memref<64x64xbf16, #tpu.memory_space<vmem>>, %arg7: memref<1x64xf32, #tpu.memory_space<vmem>>, %arg8: memref<64x16xbf16, #tpu.memory_space<vmem>>, %arg9: memref<1x16xf32, #tpu.memory_space<vmem>>, %arg10: memref<1x16xf32, #tpu.memory_space<vmem>>, %arg11: memref<1x1xf32, #tpu.memory_space<vmem>>, %arg12: memref<8x1xf32, #tpu.memory_space<vmem>>) attributes {dimension_semantics = [#tpu.dimension_semantics<parallel>], iteration_bounds = array<i64: 1>, scalar_prefetch = 0 : i64, scratch_operands = 0 : i64, tpu.core_type = #tpu.core_type<tc>, window_params = [{transform_indices = @transform_0, window_bounds = array<i64: 8, 133>}, {pipeline_mode = #tpu.pipeline_mode<synchronous>, transform_indices = @transform_1, window_bounds = array<i64: 133, 64>}, {pipeline_mode = #tpu.pipeline_mode<synchronous>, transform_indices = @transform_2, window_bounds = array<i64: 1, 64>}, {pipeline_mode = #tpu.pipeline_mode<synchronous>, transform_indices = @transform_3, window_bounds = array<i64: 64, 64>}, {pipeline_mode = #tpu.pipeline_mode<synchronous>, transform_indices = @transform_4, window_bounds = array<i64: 1, 64>}, {pipeline_mode = #tpu.pipeline_mode<synchronous>, transform_indices = @transform_5, window_bounds = array<i64: 64, 64>}, {pipeline_mode = #tpu.pipeline_mode<synchronous>, transform_indices = @transform_6, window_bounds = array<i64: 1, 64>}, {pipeline_mode = #tpu.pipeline_mode<synchronous>, transform_indices = @transform_7, window_bounds = array<i64: 64, 16>}, {pipeline_mode = #tpu.pipeline_mode<synchronous>, transform_indices = @transform_8, window_bounds = array<i64: 1, 16>}, {pipeline_mode = #tpu.pipeline_mode<synchronous>, transform_indices = @transform_9, window_bounds = array<i64: 1, 16>}, {pipeline_mode = #tpu.pipeline_mode<synchronous>, transform_indices = @transform_10, window_bounds = array<i64: 1, 1>}, {transform_indices = @transform_11, window_bounds = array<i64: 8, 1>}]} {
    %c0 = arith.constant 0 : index
    %c0_0 = arith.constant 0 : index
    %0 = vector.load %arg1[%c0, %c0_0] : memref<8x133xf32, #tpu.memory_space<vmem>>, vector<8x133xf32>
    %1 = arith.truncf %0 : vector<8x133xf32> to vector<8x133xbf16>
    %c0_1 = arith.constant 0 : index
    %c0_2 = arith.constant 0 : index
    %2 = vector.load %arg2[%c0_1, %c0_2] : memref<133x64xbf16, #tpu.memory_space<vmem>>, vector<133x64xbf16>
    %cst = arith.constant dense<0.000000e+00> : vector<8x64xf32>
    %3 = tpu.matmul %1, %2, %cst {dimension_numbers = #tpu.dot_dimension_numbers<[1], [0], [0], [1], [0, 0, 1, 1], [], []>} : vector<8x133xbf16>, vector<133x64xbf16>, vector<8x64xf32> -> vector<8x64xf32>
    %c0_3 = arith.constant 0 : index
    %c0_4 = arith.constant 0 : index
    %4 = vector.load %arg3[%c0_3, %c0_4] : memref<1x64xf32, #tpu.memory_space<vmem>>, vector<1x64xf32>
    %5 = vector.broadcast %4 : vector<1x64xf32> to vector<8x64xf32>
    %6 = arith.addf %3, %5 : vector<8x64xf32>
    %cst_5 = arith.constant 0.000000e+00 : f32
    %7 = vector.broadcast %cst_5 : f32 to vector<8x64xf32>
    %8 = arith.maximumf %6, %7 : vector<8x64xf32>
    %9 = arith.truncf %8 : vector<8x64xf32> to vector<8x64xbf16>
    %c0_6 = arith.constant 0 : index
    %c0_7 = arith.constant 0 : index
    %10 = vector.load %arg4[%c0_6, %c0_7] : memref<64x64xbf16, #tpu.memory_space<vmem>>, vector<64x64xbf16>
    %cst_8 = arith.constant dense<0.000000e+00> : vector<8x64xf32>
    %11 = tpu.matmul %9, %10, %cst_8 {dimension_numbers = #tpu.dot_dimension_numbers<[1], [0], [0], [1], [0, 0, 1, 1], [], []>} : vector<8x64xbf16>, vector<64x64xbf16>, vector<8x64xf32> -> vector<8x64xf32>
    %c0_9 = arith.constant 0 : index
    %c0_10 = arith.constant 0 : index
    %12 = vector.load %arg5[%c0_9, %c0_10] : memref<1x64xf32, #tpu.memory_space<vmem>>, vector<1x64xf32>
    %13 = vector.broadcast %12 : vector<1x64xf32> to vector<8x64xf32>
    %14 = arith.addf %11, %13 : vector<8x64xf32>
    %cst_11 = arith.constant 0.000000e+00 : f32
    %15 = vector.broadcast %cst_11 : f32 to vector<8x64xf32>
    %16 = arith.maximumf %14, %15 : vector<8x64xf32>
    %17 = arith.truncf %16 : vector<8x64xf32> to vector<8x64xbf16>
    %c0_12 = arith.constant 0 : index
    %c0_13 = arith.constant 0 : index
    %18 = vector.load %arg6[%c0_12, %c0_13] : memref<64x64xbf16, #tpu.memory_space<vmem>>, vector<64x64xbf16>
    %cst_14 = arith.constant dense<0.000000e+00> : vector<8x64xf32>
    %19 = tpu.matmul %17, %18, %cst_14 {dimension_numbers = #tpu.dot_dimension_numbers<[1], [0], [0], [1], [0, 0, 1, 1], [], []>} : vector<8x64xbf16>, vector<64x64xbf16>, vector<8x64xf32> -> vector<8x64xf32>
    %c0_15 = arith.constant 0 : index
    %c0_16 = arith.constant 0 : index
    %20 = vector.load %arg7[%c0_15, %c0_16] : memref<1x64xf32, #tpu.memory_space<vmem>>, vector<1x64xf32>
    %21 = vector.broadcast %20 : vector<1x64xf32> to vector<8x64xf32>
    %22 = arith.addf %19, %21 : vector<8x64xf32>
    %cst_17 = arith.constant 0.000000e+00 : f32
    %23 = vector.broadcast %cst_17 : f32 to vector<8x64xf32>
    %24 = arith.maximumf %22, %23 : vector<8x64xf32>
    %25 = arith.truncf %24 : vector<8x64xf32> to vector<8x64xbf16>
    %c0_18 = arith.constant 0 : index
    %c0_19 = arith.constant 0 : index
    %26 = vector.load %arg8[%c0_18, %c0_19] : memref<64x16xbf16, #tpu.memory_space<vmem>>, vector<64x16xbf16>
    %cst_20 = arith.constant dense<0.000000e+00> : vector<8x16xf32>
    %27 = tpu.matmul %25, %26, %cst_20 {dimension_numbers = #tpu.dot_dimension_numbers<[1], [0], [0], [1], [0, 0, 1, 1], [], []>} : vector<8x64xbf16>, vector<64x16xbf16>, vector<8x16xf32> -> vector<8x16xf32>
    %c0_21 = arith.constant 0 : index
    %c0_22 = arith.constant 0 : index
    %28 = vector.load %arg9[%c0_21, %c0_22] : memref<1x16xf32, #tpu.memory_space<vmem>>, vector<1x16xf32>
    %29 = vector.broadcast %28 : vector<1x16xf32> to vector<8x16xf32>
    %30 = arith.addf %27, %29 : vector<8x16xf32>
    %cst_23 = arith.constant 0.000000e+00 : f32
    %31 = vector.broadcast %cst_23 : f32 to vector<8x16xf32>
    %32 = arith.maximumf %30, %31 : vector<8x16xf32>
    %c0_24 = arith.constant 0 : index
    %c0_25 = arith.constant 0 : index
    %33 = vector.load %arg10[%c0_24, %c0_25] : memref<1x16xf32, #tpu.memory_space<vmem>>, vector<1x16xf32>
    %34 = vector.broadcast %33 : vector<1x16xf32> to vector<8x16xf32>
    %35 = arith.mulf %32, %34 : vector<8x16xf32>
    %cst_26 = arith.constant dense<0.000000e+00> : vector<8xf32>
    %36 = vector.multi_reduction <add>, %35, %cst_26 [1] : vector<8x16xf32> to vector<8xf32>
    %37 = vector.shape_cast %36 : vector<8xf32> to vector<8x1xf32>
    %c0_27 = arith.constant 0 : index
    %c0_28 = arith.constant 0 : index
    %38 = vector.load %arg11[%c0_27, %c0_28] : memref<1x1xf32, #tpu.memory_space<vmem>>, vector<1x1xf32>
    %39 = vector.broadcast %38 : vector<1x1xf32> to vector<8x1xf32>
    %40 = arith.addf %37, %39 : vector<8x1xf32>
    %cst_29 = arith.constant 0.000000e+00 : f32
    %41 = vector.broadcast %cst_29 : f32 to vector<8x1xf32>
    %42 = arith.maximumf %40, %41 : vector<8x1xf32>
    %c0_30 = arith.constant 0 : index
    %c0_31 = arith.constant 0 : index
    %43 = vector.load %arg12[%c0_30, %c0_31] : memref<8x1xf32, #tpu.memory_space<vmem>>, vector<8x1xf32>
    tpu.vector_store %arg12[%c0_30, %c0_31], %42 {strides = array<i32>} : memref<8x1xf32, #tpu.memory_space<vmem>>, vector<8x1xf32>,
    return
  }
  func.func @transform_0(%arg0: i32) -> (i32, i32) {
    %c0_i32 = arith.constant 0 : i32
    %c0_i32_0 = arith.constant 0 : i32
    return %arg0, %c0_i32 : i32, i32
  }
  func.func @transform_1(%arg0: i32) -> (i32, i32) {
    %c0_i32 = arith.constant 0 : i32
    %c0_i32_0 = arith.constant 0 : i32
    %c0_i32_1 = arith.constant 0 : i32
    return %c0_i32, %c0_i32_0 : i32, i32
  }
  func.func @transform_2(%arg0: i32) -> (i32, i32) {
    %c0_i32 = arith.constant 0 : i32
    %c0_i32_0 = arith.constant 0 : i32
    %c0_i32_1 = arith.constant 0 : i32
    return %c0_i32, %c0_i32_0 : i32, i32
  }
  func.func @transform_3(%arg0: i32) -> (i32, i32) {
    %c0_i32 = arith.constant 0 : i32
    %c0_i32_0 = arith.constant 0 : i32
    %c0_i32_1 = arith.constant 0 : i32
    return %c0_i32, %c0_i32_0 : i32, i32
  }
  func.func @transform_4(%arg0: i32) -> (i32, i32) {
    %c0_i32 = arith.constant 0 : i32
    %c0_i32_0 = arith.constant 0 : i32
    %c0_i32_1 = arith.constant 0 : i32
    return %c0_i32, %c0_i32_0 : i32, i32
  }
  func.func @transform_5(%arg0: i32) -> (i32, i32) {
    %c0_i32 = arith.constant 0 : i32
    %c0_i32_0 = arith.constant 0 : i32
    %c0_i32_1 = arith.constant 0 : i32
    return %c0_i32, %c0_i32_0 : i32, i32
  }
  func.func @transform_6(%arg0: i32) -> (i32, i32) {
    %c0_i32 = arith.constant 0 : i32
    %c0_i32_0 = arith.constant 0 : i32
    %c0_i32_1 = arith.constant 0 : i32
    return %c0_i32, %c0_i32_0 : i32, i32
  }
  func.func @transform_7(%arg0: i32) -> (i32, i32) {
    %c0_i32 = arith.constant 0 : i32
    %c0_i32_0 = arith.constant 0 : i32
    %c0_i32_1 = arith.constant 0 : i32
    return %c0_i32, %c0_i32_0 : i32, i32
  }
  func.func @transform_8(%arg0: i32) -> (i32, i32) {
    %c0_i32 = arith.constant 0 : i32
    %c0_i32_0 = arith.constant 0 : i32
    %c0_i32_1 = arith.constant 0 : i32
    return %c0_i32, %c0_i32_0 : i32, i32
  }
  func.func @transform_9(%arg0: i32) -> (i32, i32) {
    %c0_i32 = arith.constant 0 : i32
    %c0_i32_0 = arith.constant 0 : i32
    %c0_i32_1 = arith.constant 0 : i32
    return %c0_i32, %c0_i32_0 : i32, i32
  }
  func.func @transform_10(%arg0: i32) -> (i32, i32) {
    %c0_i32 = arith.constant 0 : i32
    %c0_i32_0 = arith.constant 0 : i32
    %c0_i32_1 = arith.constant 0 : i32
    return %c0_i32, %c0_i32_0 : i32, i32
  }
  func.func @transform_11(%arg0: i32) -> (i32, i32) {
    %c0_i32 = arith.constant 0 : i32
    %c0_i32_0 = arith.constant 0 : i32
    return %arg0, %c0_i32 : i32, i32
  }
}

</mosaic_0001>

<bundles_post_ra>
// kernel: net_forward.1
= control target key start
LH: loop header
LB: loop body
LE: loop exit
PB: predicated region body
PF: predicated region fallthrough
CT: control target
= control target key end

     0   :  { %v559_v0 = vmov 0   ;;  %v560_v3 = vmov 0.0   ;;  %vm120_vm0 = vcmask 39936   ;;  %vm124_vm1 = vcmask 1041408   ;;  %s734_s1 = inlined_call_operand.vmem [shape: bf16[133,64], index: 1, kind: input, shape index: {}]   ;;  %s735_s0 = inlined_call_operand.vmem [shape: f32[8,133], index: 0, kind: input, shape index: {}]   ;;  %s736_s3 = inlined_call_operand.vmem [shape: bf16[64,64], index: 3, kind: input, shape index: {}]   ;;  %s737_s5 = inlined_call_operand.vmem [shape: bf16[64,64], index: 5, kind: input, shape index: {}]   ;;  %s738_s2 = inlined_call_operand.vmem [shape: f32[1,64], index: 2, kind: input, shape index: {}]   ;;  %s739_s7 = inlined_call_operand.vmem [shape: bf16[64,16], index: 7, kind: input, shape index: {}]   ;;  %s740_s4 = inlined_call_operand.vmem [shape: f32[1,64], index: 4, kind: input, shape index: {}]   ;;  %s741_s6 = inlined_call_operand.vmem [shape: f32[1,64], index: 6, kind: input, shape index: {}]   ;;  %s742_s10 = inlined_call_operand.<no memory space> [shape: f32[1,1], index: 10, kind: input, shape index: {}]   ;;  %s743_s8 = inlined_call_operand.vmem [shape: f32[1,16], index: 8, kind: input, shape index: {}]   ;;  %s744_s9 = inlined_call_operand.vmem [shape: f32[1,16], index: 9, kind: input, shape index: {}]   ;;  %s745_s11 = inlined_call_operand.vmem [shape: f32[8,1], index: 11, kind: output, shape index: {}]  }
   0x1   :  { %131 = vmatprep.subr.bf16.mxu0 %v559_v0  ;;  %v538_v1 = vld [vmem:[%s734_s1] sm:$0xff]   ;;  %v539_v2 = vld [vmem:[%s734_s1 + $0x8] sm:$0xff]   ;;  %498 = vmatprep.subr.bf16.mxu1 %v560_v3  ;;  %v540_v4 = vld [vmem:[%s734_s1 + $0x10] sm:$0xff]   ;;  %vm125_vm2 = vcmask 1042432   ;;  %v561_v13 = vmov 65535   ;;  %vm562_vm3 = vmmov 0   ;;  %v16_v55 = vstv %s742_s10 }
   0x2   :  { %132 = vmatpush1.bf16.msra.mxu0 %v538_v1  ;;  %v541_v5 = vld [vmem:[%s734_s1 + $0x18] sm:$0xff]   ;;  %v42_v6 = vld [vmem:[%s735_s0 + $0x8] sm:$0xff]  ;;  %v547_v8 = vld [vmem:[%s736_s3] sm:$0xff]   ;;  %v126_v14 = vsel %vm124_vm1, 4294967295, %v561_v13  ;;  %506 = vmatprep.mubr.msk.bf16.mxu1 %vm562_vm3, %v560_v3  ;;  %vm212_vm4 = vcmask 523264   ;;  %vm433_vm5 = vcmask 130048  }
   0x3   :  { %133 = vmatprep.subr.bf16.mxu0 %v559_v0  ;;  %v44_v7 = vpack.c.bf16 %v42_v6, %v42_v6  ;;  %v548_v9 = vld [vmem:[%s736_s3 + $0x8] sm:$0xff]   ;;  %499 = vmatpush3.bf16.msra.mxu1 %v547_v8  ;;  %v542_v10 = vld [vmem:[%s734_s1 + $0x20] sm:$0xff]   ;;  %v544_v12 = vld [vmem:[%s734_s1 + $0x30] sm:$0xff]   ;;  %v127_v17 = vsel %vm125_vm2, %v126_v14, 0  ;;  %17 = vst [vmem:[#allocation2] sm:$0x1] %v16_v55 }
   0x4   :  { %500 = vmatprep.subr.bf16.mxu1 %v560_v3  ;;  %v543_v11 = vld [vmem:[%s734_s1 + $0x28] sm:$0xff]   ;;  %v545_v15 = vld [vmem:[%s734_s1 + $0x38] sm:$0xff]   ;;  %v546_v16 = vld [vmem:[%s734_s1 + $0x40] ss:$0 sps:$4 sm:$0x77]   ;;  %vm446_vm6 = vcmask 7168  }
   0x5   :  { %462 = vmatprep.mubr.msk.bf16.mxu0 %vm120_vm0, %v44_v7  ;;  %v129_v18 = vand.u32 %v546_v16, %v127_v17  ;;  %v41_v19 = vld [vmem:[%s735_s0] sm:$0xff]  ;;  %v549_v21 = vld [vmem:[%s736_s3 + $0x10] sm:$0xff]   ;;  %v550_v22 = vld [vmem:[%s736_s3 + $0x18] sm:$0xff]  }
   0x6   :  { %134 = vmatpush1.bf16.msra.mxu0 %v539_v2  ;;  %v43_v20 = vpack.c.bf16 %v41_v19, %v41_v19  ;;  %v452_v23 = vld [vmem:[%s738_s2] ss:$0 sm:$0xff]  ;;  %v552_v32 = vld [vmem:[%s737_s5 + $0x8] sm:$0xff]   ;;  %v553_v33 = vld [vmem:[%s737_s5 + $0x10] sm:$0xff]  }
   0x7   :  { %135 = vmatprep.subr.bf16.mxu0 %v559_v0  ;;  %501 = vmatpush3.bf16.msra.mxu1 %v548_v9  ;;  %v551_v30 = vld [vmem:[%s737_s5] sm:$0xff]   ;;  %v554_v34 = vld [vmem:[%s737_s5 + $0x18] sm:$0xff]   ;;  %v556_v44 = vld [vmem:[%s739_s7 + $0x8] sm:$0xff]  }
   0x8   :  { %502 = vmatprep.subr.bf16.mxu1 %v560_v3  ;;  %v463_v35 = vld [vmem:[%s740_s4] ss:$0 sm:$0xff]  ;;  %v557_v45 = vld [vmem:[%s739_s7 + $0x10] sm:$0xff]   ;;  %v558_v46 = vld [vmem:[%s739_s7 + $0x18] sm:$0xff]  }
   0x9   :  { %v555_v42 = vld [vmem:[%s739_s7] sm:$0xff]  }
   0xa   :  { %136 = vmatpush1.bf16.msra.mxu0 %v540_v4  ;;  %v469_v47 = vld [vmem:[%s741_s6] ss:$0 sm:$0xff] }
   0xb   :  { %137 = vmatprep.subr.bf16.mxu0 %v559_v0  ;;  %503 = vmatpush3.bf16.msra.mxu1 %v549_v21  ;;  %v475_v56 = vld [vmem:[%s743_s8] ss:$0 sm:$0xff] }
   0xc   :  { %504 = vmatprep.subr.bf16.mxu1 %v560_v3  ;;  %v481_v61 = vld [vmem:[%s744_s9] ss:$0 sm:$0xff] }
   0xd   :  { %v482_v2 = vld [vmem:[#allocation2] ss:$0 sm:$0xff] }
   0xe   :  { %138 = vmatpush1.bf16.msra.mxu0 %v541_v5 }
   0xf   :  { %139 = vmatprep.subr.bf16.mxu0 %v559_v0  ;;  %505 = vmatpush3.bf16.msra.mxu1 %v550_v22 }
  0x10   :  { %510 = vmatprep.subr.bf16.mxu1 %v560_v3 }
  0x12   :  { %140 = vmatpush1.bf16.msra.mxu0 %v542_v10 }
  0x13   :  { %141 = vmatprep.subr.bf16.mxu0 %v559_v0 }
  0x16   :  { %142 = vmatpush1.bf16.msra.mxu0 %v543_v11 }
  0x17   :  { %143 = vmatprep.subr.bf16.mxu0 %v559_v0 }
  0x1a   :  { %144 = vmatpush1.bf16.msra.mxu0 %v544_v12 }
  0x1b   :  { %145 = vmatprep.subr.bf16.mxu0 %v559_v0 }
  0x1e   :  { %146 = vmatpush1.bf16.msra.mxu0 %v545_v15 }
  0x1f   :  { %147 = vmatprep.subr.bf16.mxu0 %v559_v0 }
  0x22   :  { %148 = vmatpush1.bf16.msra.mxu0 %v129_v18 }
  0x25   :  { %164 = vmatmul.mubr.bf16.vlgmr.msra.gmra.mrb[0].mxu0 %v43_v20 }
  0xf8   :  { %v165_v24 = vpop.f32.mrb[0].mxu0 }
  0xf9   :  { %v166_v25 = vadd.f32 %v452_v23, %v165_v24  ;;  %v167_v26 = vpop.f32.mrb[1].mxu0 }
  0xfa   :  { %v168_v27 = vpop.f32.mrb[2].mxu0 }
  0xfb   :  { %v171_v28 = vmax.f32 %v166_v25, 0.0  ;;  %v169_v29 = vpop.f32.mrb[3].mxu0 }
  0xfd   :  { %v172_v31 = vpack.c.bf16 %v171_v28, %v171_v28 }
  0xff   :  { %507 = vmatmul.mubr.msk.bf16.vlgmr.msra.gmra.mrb[0].mxu1 %vm212_vm4, %v172_v31 }
 0x100   :  { %511 = vmatpush3.bf16.msra.mxu1 %v551_v30  ;;  %518 = vmatprep.mubr.msk.bf16.mxu1 %vm562_vm3, %v560_v3 }
 0x101   :  { %512 = vmatprep.subr.bf16.mxu1 %v560_v3 }
 0x104   :  { %513 = vmatpush3.bf16.msra.mxu1 %v552_v32 }
 0x105   :  { %514 = vmatprep.subr.bf16.mxu1 %v560_v3 }
 0x108   :  { %515 = vmatpush3.bf16.msra.mxu1 %v553_v33 }
 0x109   :  { %516 = vmatprep.subr.bf16.mxu1 %v560_v3 }
 0x10c   :  { %517 = vmatpush3.bf16.msra.mxu1 %v554_v34 }
 0x10d   :  { %522 = vmatprep.subr.bf16.mxu1 %v560_v3 }
 0x1d2   :  { %v250_v36 = vpop.f32.mrb[0].mxu1 }
 0x1d3   :  { %v251_v37 = vadd.f32 %v463_v35, %v250_v36  ;;  %v508_v38 = vpop.f32.mrb[1].mxu1 }
 0x1d4   :  { %v253_v39 = vpop.f32.mrb[2].mxu1 }
 0x1d5   :  { %v256_v40 = vmax.f32 %v251_v37, 0.0  ;;  %v509_v41 = vpop.f32.mrb[3].mxu1 }
 0x1d7   :  { %v257_v43 = vpack.c.bf16 %v256_v40, %v256_v40 }
 0x1d9   :  { %519 = vmatmul.mubr.msk.bf16.vlgmr.msra.gmra.mrb[4].mxu1 %vm212_vm4, %v257_v43 }
 0x1da   :  { %523 = vmatpush3.bf16.msra.mxu1 %v555_v42  ;;  %530 = vmatprep.mubr.msk.bf16.mxu1 %vm562_vm3, %v560_v3 }
 0x1db   :  { %524 = vmatprep.subr.bf16.mxu1 %v560_v3 }
 0x1de   :  { %525 = vmatpush3.bf16.msra.mxu1 %v556_v44 }
 0x1df   :  { %526 = vmatprep.subr.bf16.mxu1 %v560_v3 }
 0x1e2   :  { %527 = vmatpush3.bf16.msra.mxu1 %v557_v45 }
 0x1e3   :  { %528 = vmatprep.subr.bf16.mxu1 %v560_v3 }
 0x1e6   :  { %529 = vmatpush3.bf16.msra.mxu1 %v558_v46 }
 0x2ac   :  { %v334_v48 = vpop.f32.mrb[4].mxu1 }
 0x2ad   :  { %v335_v49 = vadd.f32 %v469_v47, %v334_v48  ;;  %v520_v50 = vpop.f32.mrb[5].mxu1 }
 0x2ae   :  { %v337_v51 = vpop.f32.mrb[6].mxu1 }
 0x2af   :  { %v340_v52 = vmax.f32 %v335_v49, 0.0  ;;  %v521_v53 = vpop.f32.mrb[7].mxu1 }
 0x2b1   :  { %v341_v54 = vpack.c.bf16 %v340_v52, %v340_v52 }
 0x2b3   :  { %531 = vmatmul.mubr.msk.bf16.vlgmr.msra.gmra.mrb[8].mxu1 %vm212_vm4, %v341_v54 }
 0x386   :  { %v418_v57 = vpop.f32.mrb[8].mxu1 }
 0x387   :  { %v419_v58 = vadd.f32 %v475_v56, %v418_v57  ;;  %v532_v59 = vpop.f32.mrb[9].mxu1 }
 0x388   :  { %v421_v60 = vpop.f32.mrb[10].mxu1 }
 0x389   :  { %v424_v62 = vmax.f32 %v419_v58, 0.0  ;;  %v533_v63 = vpop.f32.mrb[11].mxu1 }
 0x38b   :  { %v432_v0 = vmul.f32 %v481_v61, %v424_v62 }
 0x38d   :  { %v434_v1 = vsel %vm433_vm5, %v432_v0, 0.0 }
 0x38e   :  { %435 = vadd.xlane.f32.xlu0 %v434_v1 }
 0x41b   :  { %v436_v3 = vpop.xlane.xlu0 %435 }
 0x41c   :  { %v444_v4 = vadd.f32 %v482_v2, %v436_v3 }
 0x41e   :  { %v445_v5 = vmax.f32 %v444_v4, 0.0 }
 0x420   :  { %447 = vst.msk [vmem:[%s745_s11] sm:$0xff] %vm446_vm6, %v445_v5 }

</bundles_post_ra>
